<compile_context>
chip_gen: v7x
topology: tpu7x:2x2x1
jax: 0.10.0
libtpu: 0.0.40
codegen_flags: <defaults>
</compile_context>

<pallas_src>
from functools import partial

import jax
import jax.numpy as jnp
from jax.experimental import pallas as pl
from jax.experimental.pallas import tpu as pltpu


def _rebuild_fc_kernel(x_ref, w1x_ref, w1g_ref, b1_ref, w2_ref, b2_ref, o_ref,
                       *, approximate_gelu):
    # x_ref   : (TB, N, C)  f32          w1x_ref / w1g_ref : (C, H) compute dtype
    # b1_ref  : (1, H) f32               w2_ref : (H, O) compute dtype
    # b2_ref  : (1, O) f32               o_ref  : (TB*N, O) f32
    x = x_ref[...]
    TB, N, C = x.shape

    # Per-batch global feature: max over the token (sublane) axis — torch .max(1)[0].
    g = jnp.max(x, axis=1)                                   # (TB, C)

    # (TB, N, C) -> (TB*N, C): sublane merge, layout-free when N % 8 == 0.
    x2 = x.reshape(TB * N, C)

    cdt = w1x_ref.dtype
    # fc1 in split form: patch @ w1 == x @ w1[C:] + g @ w1[:C]   (no concat,
    # no redundant MXU rows for the broadcast global feature).
    hx = jnp.dot(x2.astype(cdt), w1x_ref[...],
                 preferred_element_type=jnp.float32)         # (TB*N, H)
    hg = jnp.dot(g.astype(cdt), w1g_ref[...],
                 preferred_element_type=jnp.float32)         # (TB, H)
    hg = hg + b1_ref[...]                                    # fold bias at (TB, H)

    # Broadcast the per-batch row block to (TB*N, H); hx never changes layout.
    H = hg.shape[-1]
    h = hx + jnp.broadcast_to(hg[:, None, :], (TB, N, H)).reshape(TB * N, H)

    # GELU in f32; tanh form goes to the EUP slot, erf form matches torch exactly.
    h = jax.nn.gelu(h, approximate=approximate_gelu)

    # fc2 straight into the un-padded output block (block minor dim == array
    # minor dim, so the BlockSpec is legal; HBM writeback is exactly O columns).
    o = jnp.dot(h.astype(w2_ref.dtype), w2_ref[...],
                preferred_element_type=jnp.float32)
    o_ref[...] = (o + b2_ref[...]).astype(o_ref.dtype)


def _choose_tiling(B, N, target_rows=512):
    """Return (TB, B_pad): batches folded per grid step, padded batch size.

    * TB*N ≈ target_rows to amortize the ~0.35 us per-grid-step overhead and
      fill the MXU M dimension (measured: >=512-row blocks reach ~85% of the
      HBM roofline).
    * TB*N must stay a multiple of 8 so the (TB,N,C)->(TB*N,C) merge and the
      2-D output block are sublane-aligned; if N itself is not a multiple of 8
      we fall back to a single grid step (block == full array, always legal).
    * With more than one step, prefer an even step count so the "parallel"
      grid axis balances across the two v7x TensorCores.
    """
    if N % 8 != 0:
        # TODO(synk): pad N to a multiple of 8 to enable multi-step tiling.
        return B, B
    tb = max(1, min(B, max(1, target_rows // N)))
    groups = -(-B // tb)
    if groups > 1 and groups % 2 == 1:
        tb = -(-B // (groups + 1))
        groups = -(-B // tb)
    return tb, groups * tb


def simple_rebuild_fc(rec_feature, w1, b1, w2, b2, *, step, freedom,
                      compute_dtype=jnp.bfloat16, approximate_gelu=True,
                      single_buffer_weights=True, target_rows=512):
    """rec_feature: (B, N, C) -> (B, N, step, freedom).

    compute_dtype    : MXU operand dtype (accumulation is always f32).  bf16
                       gives ~3x MXU throughput on v6e/v7x and halves weight /
                       activation bytes; jnp.float32 restores exact numerics.
    approximate_gelu : tanh GELU (EUP slot) vs torch's default exact erf GELU.
    """
    B, N, C = rec_feature.shape
    two_c, H = w1.shape
    assert two_c == 2 * C, "fc1 expects input_dims == 2*C"
    O = w2.shape[1]
    assert O == step * freedom

    # Split fc1: rows [0:C] multiply the (broadcast) global feature, rows
    # [C:2C] the per-token feature — identical to concat+matmul at half the
    # MXU rows.  Weights are cast to the MXU operand dtype here (one-time).
    w1_g = w1[:C].astype(compute_dtype)
    w1_x = w1[C:].astype(compute_dtype)
    w2_c = w2.astype(compute_dtype)
    b1_r = jnp.asarray(b1, jnp.float32).reshape(1, H)   # biases added post-accum in f32
    b2_r = jnp.asarray(b2, jnp.float32).reshape(1, O)
    # Production note: pad C and H to 128 (v5e) / 256 (v6e, v7x) multiples here
    # for MXU fill when they are not already; demo shapes are VPU/DMA-bound.

    TB, B_pad = _choose_tiling(B, N, target_rows)
    groups = B_pad // TB
    x = rec_feature
    if B_pad != B:
        x = jnp.pad(x, ((0, B_pad - B), (0, 0), (0, 0)))

    # Grid-invariant weights: constant index_map => DMA'd once; Buffered(1)
    # drops their second pipeline buffer (free VMEM on v7x/v5e).
    w_mode = pl.Buffered(1) if single_buffer_weights else None

    def w_spec(shape):
        return pl.BlockSpec(shape, lambda g: (0,) * len(shape), pipeline_mode=w_mode)

    # Rough per-step VMEM footprint; only raise the scoped-VMEM limit when the
    # conservative default (16 MiB on v5e) would be exceeded, and stay well
    # under v7x's 64 MiB physical VMEM.
    bpe = jnp.finfo(compute_dtype).bits // 8
    vmem_need = (2 * TB * N * C * 4                                   # x blocks (dbl-buffered)
                 + 2 * TB * N * O * 4                                 # out blocks
                 + (2 * C * H + H * O) * bpe * (1 if single_buffer_weights else 2)
                 + 3 * TB * N * H * 4)                                # hx / h / gelu temps (f32)
    vmem_limit = None
    if vmem_need > 12 * 1024 * 1024:
        vmem_limit = int(min(2 * vmem_need, 56 * 1024 * 1024))

    kernel = partial(_rebuild_fc_kernel, approximate_gelu=approximate_gelu)

    out = pl.pallas_call(
        kernel,
        out_shape=jax.ShapeDtypeStruct((B_pad * N, O), jnp.float32),
        grid_spec=pltpu.PrefetchScalarGridSpec(
            num_scalar_prefetch=0,
            grid=(groups,),
            in_specs=[
                pl.BlockSpec((TB, N, C), lambda g: (g, 0, 0)),
                w_spec((C, H)),        # w1_x
                w_spec((C, H)),        # w1_g
                w_spec((1, H)),        # b1
                w_spec((H, O)),        # w2
                w_spec((1, O)),        # b2
            ],
            out_specs=pl.BlockSpec((TB * N, O), lambda g: (g, 0)),
        ),
        compiler_params=pltpu.CompilerParams(
            dimension_semantics=("parallel",),
            vmem_limit_bytes=vmem_limit),
    )(x, w1_x, w1_g, b1_r, w2_c, b2_r)

    return out[: B * N].reshape(B, N, step, freedom)


def _reference(rec_feature, w1, b1, w2, b2, *, step, freedom):
    """Pure-JAX f32 / erf-GELU reference matching the torch module."""
    B, N, C = rec_feature.shape
    g = jnp.max(rec_feature, axis=1)                               # (B, C)
    patch = jnp.concatenate(
        [jnp.broadcast_to(g[:, None, :], (B, N, C)), rec_feature], axis=-1)
    h = jax.nn.gelu(patch @ w1 + b1.reshape(1, -1), approximate=False)
    o = h @ w2 + b2.reshape(1, -1)
    return o.reshape(B, N, step, freedom)


if __name__ == "__main__":
    # Small shapes consistent with the module: feature dim C, input_dims = 2C.
    B, N, C = 2, 8, 16
    input_dims = 2 * C
    hidden_dim = 32
    step, freedom = 4, 3
    out_dim = step * freedom

    key = jax.random.PRNGKey(0)
    k_x, k_w1, k_b1, k_w2, k_b2 = jax.random.split(key, 5)

    rec_feature = jax.random.normal(k_x, (B, N, C), dtype=jnp.float32)
    # Synthetic parameters with MLP(input_dims, hidden_dim, step*freedom) shapes.
    w1 = jax.random.normal(k_w1, (input_dims, hidden_dim), dtype=jnp.float32) * 0.05
    b1 = jax.random.normal(k_b1, (hidden_dim,), dtype=jnp.float32) * 0.01
    w2 = jax.random.normal(k_w2, (hidden_dim, out_dim), dtype=jnp.float32) * 0.05
    b2 = jax.random.normal(k_b2, (out_dim,), dtype=jnp.float32) * 0.01

    fast = partial(simple_rebuild_fc, step=step, freedom=freedom)
    try:
        out = jax.block_until_ready(jax.jit(fast)(rec_feature, w1, b1, w2, b2))
    except Exception:
        # Fallback if this jax build rejects pl.Buffered(1) single-buffering.
        out = jax.block_until_ready(
            jax.jit(partial(fast, single_buffer_weights=False))(
                rec_feature, w1, b1, w2, b2))

    ref = _reference(rec_feature, w1, b1, w2, b2, step=step, freedom=freedom)
    assert out.shape == (B, N, step, freedom)
    # bf16 MXU operands + tanh GELU => loosened tolerance vs the f32/erf reference.
    assert jnp.allclose(out, ref, atol=2e-2, rtol=2e-2), \
        float(jnp.max(jnp.abs(out - ref)))

    print("KERNEL_OK")
</pallas_src>

<mosaic_0001>
module attributes {stable_mosaic.version = 11 : i64} {
  func.func @_rebuild_fc_kernel(%arg0: i32, %arg1: memref<2x8x16xf32, #tpu.memory_space<vmem>>, %arg2: memref<16x32xbf16, #tpu.memory_space<vmem>>, %arg3: memref<16x32xbf16, #tpu.memory_space<vmem>>, %arg4: memref<1x32xf32, #tpu.memory_space<vmem>>, %arg5: memref<32x12xbf16, #tpu.memory_space<vmem>>, %arg6: memref<1x12xf32, #tpu.memory_space<vmem>>, %arg7: memref<16x12xf32, #tpu.memory_space<vmem>>) attributes {dimension_semantics = [#tpu.dimension_semantics<parallel>], iteration_bounds = array<i64: 1>, scalar_prefetch = 0 : i64, scratch_operands = 0 : i64, tpu.core_type = #tpu.core_type<tc>, window_params = [{transform_indices = @transform_0, window_bounds = array<i64: 2, 8, 16>}, {pipeline_mode = #tpu.pipeline_mode<synchronous>, transform_indices = @transform_1, window_bounds = array<i64: 16, 32>}, {pipeline_mode = #tpu.pipeline_mode<synchronous>, transform_indices = @transform_2, window_bounds = array<i64: 16, 32>}, {pipeline_mode = #tpu.pipeline_mode<synchronous>, transform_indices = @transform_3, window_bounds = array<i64: 1, 32>}, {pipeline_mode = #tpu.pipeline_mode<synchronous>, transform_indices = @transform_4, window_bounds = array<i64: 32, 12>}, {pipeline_mode = #tpu.pipeline_mode<synchronous>, transform_indices = @transform_5, window_bounds = array<i64: 1, 12>}, {transform_indices = @transform_6, window_bounds = array<i64: 16, 12>}]} {
    %c0 = arith.constant 0 : index
    %c0_0 = arith.constant 0 : index
    %c0_1 = arith.constant 0 : index
    %0 = vector.load %arg1[%c0, %c0_0, %c0_1] : memref<2x8x16xf32, #tpu.memory_space<vmem>>, vector<2x8x16xf32>
    %cst = arith.constant dense<0xFF800000> : vector<2x16xf32>
    %1 = vector.multi_reduction <maximumf>, %0, %cst [1] : vector<2x8x16xf32> to vector<2x16xf32>
    %2 = vector.shape_cast %0 : vector<2x8x16xf32> to vector<16x16xf32>
    %3 = arith.truncf %2 : vector<16x16xf32> to vector<16x16xbf16>
    %c0_2 = arith.constant 0 : index
    %c0_3 = arith.constant 0 : index
    %4 = vector.load %arg2[%c0_2, %c0_3] : memref<16x32xbf16, #tpu.memory_space<vmem>>, vector<16x32xbf16>
    %cst_4 = arith.constant dense<0.000000e+00> : vector<16x32xf32>
    %5 = tpu.matmul %3, %4, %cst_4 {dimension_numbers = #tpu.dot_dimension_numbers<[1], [0], [0], [1], [0, 0, 1, 1], [], []>} : vector<16x16xbf16>, vector<16x32xbf16>, vector<16x32xf32> -> vector<16x32xf32>
    %6 = arith.truncf %1 : vector<2x16xf32> to vector<2x16xbf16>
    %c0_5 = arith.constant 0 : index
    %c0_6 = arith.constant 0 : index
    %7 = vector.load %arg3[%c0_5, %c0_6] : memref<16x32xbf16, #tpu.memory_space<vmem>>, vector<16x32xbf16>
    %cst_7 = arith.constant dense<0.000000e+00> : vector<2x32xf32>
    %8 = tpu.matmul %6, %7, %cst_7 {dimension_numbers = #tpu.dot_dimension_numbers<[1], [0], [0], [1], [0, 0, 1, 1], [], []>} : vector<2x16xbf16>, vector<16x32xbf16>, vector<2x32xf32> -> vector<2x32xf32>
    %c0_8 = arith.constant 0 : index
    %c0_9 = arith.constant 0 : index
    %9 = vector.load %arg4[%c0_8, %c0_9] : memref<1x32xf32, #tpu.memory_space<vmem>>, vector<1x32xf32>
    %10 = vector.broadcast %9 : vector<1x32xf32> to vector<2x32xf32>
    %11 = arith.addf %8, %10 : vector<2x32xf32>
    %12 = vector.shape_cast %11 : vector<2x32xf32> to vector<2x1x32xf32>
    %13 = vector.shape_cast %12 : vector<2x1x32xf32> to vector<2x1x32xf32>
    %14 = vector.broadcast %13 : vector<2x1x32xf32> to vector<2x8x32xf32>
    %15 = vector.shape_cast %14 : vector<2x8x32xf32> to vector<16x32xf32>
    %16 = arith.addf %5, %15 : vector<16x32xf32>
    %17 = arith.mulf %16, %16 : vector<16x32xf32>
    %18 = arith.mulf %16, %17 : vector<16x32xf32>
    %cst_10 = arith.constant 4.471500e-02 : f32
    %19 = vector.broadcast %cst_10 : f32 to vector<16x32xf32>
    %20 = arith.mulf %19, %18 : vector<16x32xf32>
    %21 = arith.addf %16, %20 : vector<16x32xf32>
    %cst_11 = arith.constant 0.797884583 : f32
    %22 = vector.broadcast %cst_11 : f32 to vector<16x32xf32>
    %23 = arith.mulf %22, %21 : vector<16x32xf32>
    %24 = math.tanh %23 : vector<16x32xf32>
    %cst_12 = arith.constant 1.000000e+00 : f32
    %25 = vector.broadcast %cst_12 : f32 to vector<16x32xf32>
    %26 = arith.addf %25, %24 : vector<16x32xf32>
    %cst_13 = arith.constant 5.000000e-01 : f32
    %27 = vector.broadcast %cst_13 : f32 to vector<16x32xf32>
    %28 = arith.mulf %27, %26 : vector<16x32xf32>
    %29 = arith.mulf %16, %28 : vector<16x32xf32>
    %30 = arith.truncf %29 : vector<16x32xf32> to vector<16x32xbf16>
    %c0_14 = arith.constant 0 : index
    %c0_15 = arith.constant 0 : index
    %31 = vector.load %arg5[%c0_14, %c0_15] : memref<32x12xbf16, #tpu.memory_space<vmem>>, vector<32x12xbf16>
    %cst_16 = arith.constant dense<0.000000e+00> : vector<16x12xf32>
    %32 = tpu.matmul %30, %31, %cst_16 {dimension_numbers = #tpu.dot_dimension_numbers<[1], [0], [0], [1], [0, 0, 1, 1], [], []>} : vector<16x32xbf16>, vector<32x12xbf16>, vector<16x12xf32> -> vector<16x12xf32>
    %c0_17 = arith.constant 0 : index
    %c0_18 = arith.constant 0 : index
    %33 = vector.load %arg6[%c0_17, %c0_18] : memref<1x12xf32, #tpu.memory_space<vmem>>, vector<1x12xf32>
    %34 = vector.broadcast %33 : vector<1x12xf32> to vector<16x12xf32>
    %35 = arith.addf %32, %34 : vector<16x12xf32>
    %c0_19 = arith.constant 0 : index
    %c0_20 = arith.constant 0 : index
    %36 = vector.load %arg7[%c0_19, %c0_20] : memref<16x12xf32, #tpu.memory_space<vmem>>, vector<16x12xf32>
    tpu.vector_store %arg7[%c0_19, %c0_20], %35 {strides = array<i32>} : memref<16x12xf32, #tpu.memory_space<vmem>>, vector<16x12xf32>,
    return
  }
  func.func @transform_0(%arg0: i32) -> (i32, i32, i32) {
    %c0_i32 = arith.constant 0 : i32
    %c0_i32_0 = arith.constant 0 : i32
    %c0_i32_1 = arith.constant 0 : i32
    return %arg0, %c0_i32, %c0_i32_0 : i32, i32, i32
  }
  func.func @transform_1(%arg0: i32) -> (i32, i32) {
    %c0_i32 = arith.constant 0 : i32
    %c0_i32_0 = arith.constant 0 : i32
    %c0_i32_1 = arith.constant 0 : i32
    return %c0_i32, %c0_i32_0 : i32, i32
  }
  func.func @transform_2(%arg0: i32) -> (i32, i32) {
    %c0_i32 = arith.constant 0 : i32
    %c0_i32_0 = arith.constant 0 : i32
    %c0_i32_1 = arith.constant 0 : i32
    return %c0_i32, %c0_i32_0 : i32, i32
  }
  func.func @transform_3(%arg0: i32) -> (i32, i32) {
    %c0_i32 = arith.constant 0 : i32
    %c0_i32_0 = arith.constant 0 : i32
    %c0_i32_1 = arith.constant 0 : i32
    return %c0_i32, %c0_i32_0 : i32, i32
  }
  func.func @transform_4(%arg0: i32) -> (i32, i32) {
    %c0_i32 = arith.constant 0 : i32
    %c0_i32_0 = arith.constant 0 : i32
    %c0_i32_1 = arith.constant 0 : i32
    return %c0_i32, %c0_i32_0 : i32, i32
  }
  func.func @transform_5(%arg0: i32) -> (i32, i32) {
    %c0_i32 = arith.constant 0 : i32
    %c0_i32_0 = arith.constant 0 : i32
    %c0_i32_1 = arith.constant 0 : i32
    return %c0_i32, %c0_i32_0 : i32, i32
  }
  func.func @transform_6(%arg0: i32) -> (i32, i32) {
    %c0_i32 = arith.constant 0 : i32
    %c0_i32_0 = arith.constant 0 : i32
    return %arg0, %c0_i32 : i32, i32
  }
}

module attributes {stable_mosaic.version = 11 : i64} {
  func.func @_rebuild_fc_kernel(%arg0: i32, %arg1: memref<2x8x16xf32, #tpu.memory_space<vmem>>, %arg2: memref<16x32xbf16, #tpu.memory_space<vmem>>, %arg3: memref<16x32xbf16, #tpu.memory_space<vmem>>, %arg4: memref<1x32xf32, #tpu.memory_space<vmem>>, %arg5: memref<32x12xbf16, #tpu.memory_space<vmem>>, %arg6: memref<1x12xf32, #tpu.memory_space<vmem>>, %arg7: memref<16x12xf32, #tpu.memory_space<vmem>>) attributes {dimension_semantics = [#tpu.dimension_semantics<parallel>], iteration_bounds = array<i64: 1>, scalar_prefetch = 0 : i64, scratch_operands = 0 : i64, tpu.core_type = #tpu.core_type<tc>, window_params = [{transform_indices = @transform_0, window_bounds = array<i64: 2, 8, 16>}, {pipeline_mode = #tpu.pipeline_mode<synchronous>, transform_indices = @transform_1, window_bounds = array<i64: 16, 32>}, {pipeline_mode = #tpu.pipeline_mode<synchronous>, transform_indices = @transform_2, window_bounds = array<i64: 16, 32>}, {pipeline_mode = #tpu.pipeline_mode<synchronous>, transform_indices = @transform_3, window_bounds = array<i64: 1, 32>}, {pipeline_mode = #tpu.pipeline_mode<synchronous>, transform_indices = @transform_4, window_bounds = array<i64: 32, 12>}, {pipeline_mode = #tpu.pipeline_mode<synchronous>, transform_indices = @transform_5, window_bounds = array<i64: 1, 12>}, {transform_indices = @transform_6, window_bounds = array<i64: 16, 12>}]} {
    %c0 = arith.constant 0 : index
    %c0_0 = arith.constant 0 : index
    %c0_1 = arith.constant 0 : index
    %0 = vector.load %arg1[%c0, %c0_0, %c0_1] : memref<2x8x16xf32, #tpu.memory_space<vmem>>, vector<2x8x16xf32>
    %cst = arith.constant dense<0xFF800000> : vector<2x16xf32>
    %1 = vector.multi_reduction <maximumf>, %0, %cst [1] : vector<2x8x16xf32> to vector<2x16xf32>
    %2 = vector.shape_cast %0 : vector<2x8x16xf32> to vector<16x16xf32>
    %3 = arith.truncf %2 : vector<16x16xf32> to vector<16x16xbf16>
    %c0_2 = arith.constant 0 : index
    %c0_3 = arith.constant 0 : index
    %4 = vector.load %arg2[%c0_2, %c0_3] : memref<16x32xbf16, #tpu.memory_space<vmem>>, vector<16x32xbf16>
    %cst_4 = arith.constant dense<0.000000e+00> : vector<16x32xf32>
    %5 = tpu.matmul %3, %4, %cst_4 {dimension_numbers = #tpu.dot_dimension_numbers<[1], [0], [0], [1], [0, 0, 1, 1], [], []>} : vector<16x16xbf16>, vector<16x32xbf16>, vector<16x32xf32> -> vector<16x32xf32>
    %6 = arith.truncf %1 : vector<2x16xf32> to vector<2x16xbf16>
    %c0_5 = arith.constant 0 : index
    %c0_6 = arith.constant 0 : index
    %7 = vector.load %arg3[%c0_5, %c0_6] : memref<16x32xbf16, #tpu.memory_space<vmem>>, vector<16x32xbf16>
    %cst_7 = arith.constant dense<0.000000e+00> : vector<2x32xf32>
    %8 = tpu.matmul %6, %7, %cst_7 {dimension_numbers = #tpu.dot_dimension_numbers<[1], [0], [0], [1], [0, 0, 1, 1], [], []>} : vector<2x16xbf16>, vector<16x32xbf16>, vector<2x32xf32> -> vector<2x32xf32>
    %c0_8 = arith.constant 0 : index
    %c0_9 = arith.constant 0 : index
    %9 = vector.load %arg4[%c0_8, %c0_9] : memref<1x32xf32, #tpu.memory_space<vmem>>, vector<1x32xf32>
    %10 = vector.broadcast %9 : vector<1x32xf32> to vector<2x32xf32>
    %11 = arith.addf %8, %10 : vector<2x32xf32>
    %12 = vector.shape_cast %11 : vector<2x32xf32> to vector<2x1x32xf32>
    %13 = vector.shape_cast %12 : vector<2x1x32xf32> to vector<2x1x32xf32>
    %14 = vector.broadcast %13 : vector<2x1x32xf32> to vector<2x8x32xf32>
    %15 = vector.shape_cast %14 : vector<2x8x32xf32> to vector<16x32xf32>
    %16 = arith.addf %5, %15 : vector<16x32xf32>
    %17 = arith.mulf %16, %16 : vector<16x32xf32>
    %18 = arith.mulf %16, %17 : vector<16x32xf32>
    %cst_10 = arith.constant 4.471500e-02 : f32
    %19 = vector.broadcast %cst_10 : f32 to vector<16x32xf32>
    %20 = arith.mulf %19, %18 : vector<16x32xf32>
    %21 = arith.addf %16, %20 : vector<16x32xf32>
    %cst_11 = arith.constant 0.797884583 : f32
    %22 = vector.broadcast %cst_11 : f32 to vector<16x32xf32>
    %23 = arith.mulf %22, %21 : vector<16x32xf32>
    %24 = math.tanh %23 : vector<16x32xf32>
    %cst_12 = arith.constant 1.000000e+00 : f32
    %25 = vector.broadcast %cst_12 : f32 to vector<16x32xf32>
    %26 = arith.addf %25, %24 : vector<16x32xf32>
    %cst_13 = arith.constant 5.000000e-01 : f32
    %27 = vector.broadcast %cst_13 : f32 to vector<16x32xf32>
    %28 = arith.mulf %27, %26 : vector<16x32xf32>
    %29 = arith.mulf %16, %28 : vector<16x32xf32>
    %30 = arith.truncf %29 : vector<16x32xf32> to vector<16x32xbf16>
    %c0_14 = arith.constant 0 : index
    %c0_15 = arith.constant 0 : index
    %31 = vector.load %arg5[%c0_14, %c0_15] : memref<32x12xbf16, #tpu.memory_space<vmem>>, vector<32x12xbf16>
    %cst_16 = arith.constant dense<0.000000e+00> : vector<16x12xf32>
    %32 = tpu.matmul %30, %31, %cst_16 {dimension_numbers = #tpu.dot_dimension_numbers<[1], [0], [0], [1], [0, 0, 1, 1], [], []>} : vector<16x32xbf16>, vector<32x12xbf16>, vector<16x12xf32> -> vector<16x12xf32>
    %c0_17 = arith.constant 0 : index
    %c0_18 = arith.constant 0 : index
    %33 = vector.load %arg6[%c0_17, %c0_18] : memref<1x12xf32, #tpu.memory_space<vmem>>, vector<1x12xf32>
    %34 = vector.broadcast %33 : vector<1x12xf32> to vector<16x12xf32>
    %35 = arith.addf %32, %34 : vector<16x12xf32>
    %c0_19 = arith.constant 0 : index
    %c0_20 = arith.constant 0 : index
    %36 = vector.load %arg7[%c0_19, %c0_20] : memref<16x12xf32, #tpu.memory_space<vmem>>, vector<16x12xf32>
    tpu.vector_store %arg7[%c0_19, %c0_20], %35 {strides = array<i32>} : memref<16x12xf32, #tpu.memory_space<vmem>>, vector<16x12xf32>,
    return
  }
  func.func @transform_0(%arg0: i32) -> (i32, i32, i32) {
    %c0_i32 = arith.constant 0 : i32
    %c0_i32_0 = arith.constant 0 : i32
    %c0_i32_1 = arith.constant 0 : i32
    return %arg0, %c0_i32, %c0_i32_0 : i32, i32, i32
  }
  func.func @transform_1(%arg0: i32) -> (i32, i32) {
    %c0_i32 = arith.constant 0 : i32
    %c0_i32_0 = arith.constant 0 : i32
    %c0_i32_1 = arith.constant 0 : i32
    return %c0_i32, %c0_i32_0 : i32, i32
  }
  func.func @transform_2(%arg0: i32) -> (i32, i32) {
    %c0_i32 = arith.constant 0 : i32
    %c0_i32_0 = arith.constant 0 : i32
    %c0_i32_1 = arith.constant 0 : i32
    return %c0_i32, %c0_i32_0 : i32, i32
  }
  func.func @transform_3(%arg0: i32) -> (i32, i32) {
    %c0_i32 = arith.constant 0 : i32
    %c0_i32_0 = arith.constant 0 : i32
    %c0_i32_1 = arith.constant 0 : i32
    return %c0_i32, %c0_i32_0 : i32, i32
  }
  func.func @transform_4(%arg0: i32) -> (i32, i32) {
    %c0_i32 = arith.constant 0 : i32
    %c0_i32_0 = arith.constant 0 : i32
    %c0_i32_1 = arith.constant 0 : i32
    return %c0_i32, %c0_i32_0 : i32, i32
  }
  func.func @transform_5(%arg0: i32) -> (i32, i32) {
    %c0_i32 = arith.constant 0 : i32
    %c0_i32_0 = arith.constant 0 : i32
    %c0_i32_1 = arith.constant 0 : i32
    return %c0_i32, %c0_i32_0 : i32, i32
  }
  func.func @transform_6(%arg0: i32) -> (i32, i32) {
    %c0_i32 = arith.constant 0 : i32
    %c0_i32_0 = arith.constant 0 : i32
    return %arg0, %c0_i32 : i32, i32
  }
}

</mosaic_0001>

<bundles_post_ra>
// kernel: simple_rebuild_fc.1
= control target key start
LH: loop header
LB: loop body
LE: loop exit
PB: predicated region body
PF: predicated region fallthrough
CT: control target
= control target key end

     0   :  { %vm26_vm0 = vcmask 130048   ;;  %v335_v0 = vmov 0.0   ;;  %vm336_vm1 = vmmov 0   ;;  %vm59_vm2 = vcmask 1041409   ;;  %s410_s2 = inlined_call_operand.vmem [shape: bf16[16,32], index: 2, kind: input, shape index: {}]   ;;  %s411_s0 = inlined_call_operand.vmem [shape: f32[2,8,16], index: 0, kind: input, shape index: {}]   ;;  %s412_s1 = inlined_call_operand.vmem [shape: bf16[16,32], index: 1, kind: input, shape index: {}]   ;;  %s413_s4 = inlined_call_operand.vmem [shape: bf16[32,12], index: 4, kind: input, shape index: {}]   ;;  %s414_s3 = inlined_call_operand.vmem [shape: f32[1,32], index: 3, kind: input, shape index: {}]   ;;  %s415_s5 = inlined_call_operand.vmem [shape: f32[1,12], index: 5, kind: input, shape index: {}]   ;;  %s416_s6 = inlined_call_operand.vmem [shape: f32[16,12], index: 6, kind: output, shape index: {}]  }
   0x1   :  { %304 = vmatprep.subr.bf16.mxu0 %v335_v0  ;;  %v327_v1 = vld [vmem:[%s410_s2] sm:$0xff]   ;;  %306 = vmatprep.mubr.msk.bf16.mxu0 %vm336_vm1, %v335_v0  ;;  %v25_v3 = vld [vmem:[%s411_s0 + $0x8] sm:$0xff]  ;;  %v337_v32 = vmov 1966171168   ;;  %v115_v34 = vlaneseq  ;;  %vm236_vm3 = vcmask 261120   ;;  %vm281_vm4 = vcmask 97280  }
   0x2   :  { %v24_v2 = vld [vmem:[%s411_s0] sm:$0xff]  ;;  %310 = vmatprep.subr.bf16.mxu1 %v335_v0  ;;  %312 = vmatprep.mubr.msk.bf16.mxu1 %vm336_vm1, %v335_v0  ;;  %v34_v5 = vsel %vm26_vm0, %v25_v3, -inf  ;;  %v330_v27 = vld [vmem:[%s413_s4 + $0x8] sm:$0xff]   ;;  %v113_v33 = vunpack.c.l.s4 %v337_v32 }
   0x3   :  { %305 = vmatpush3.bf16.msra.mxu0 %v327_v1  ;;  %v27_v4 = vsel %vm26_vm0, %v24_v2, -inf  ;;  %v328_v6 = vld [vmem:[%s412_s1] sm:$0xff]   ;;  %v35_v8 = vrot.slane %v34_v5, 4  ;;  %v41_v9 = vpack.c.bf16 %v25_v3, %v24_v2  ;;  %v116_v36 = vshrl.u32 %v115_v34, 7 }
   0x4   :  { %v28_v7 = vrot.slane %v27_v4, 4  ;;  %316 = vmatprep.subr.bf16.mxu0 %v335_v0  ;;  %311 = vmatpush3.bf16.msra.mxu1 %v328_v6  ;;  %v329_v26 = vld [vmem:[%s413_s4] sm:$0xff]   ;;  %v114_v35 = vunpack.c.0.s8 %v113_v33 }
   0x5   :  { %v36_v11 = vmax.f32 %v34_v5, %v35_v8  ;;  %v288_v37 = vld [vmem:[%s414_s3] ss:$0 sm:$0xff]  ;;  %v136_v45 = vsub.s32 0, %v116_v36 }
   0x6   :  { %v29_v10 = vmax.f32 %v27_v4, %v28_v7  ;;  %v117_v38 = vsub.s32 %v114_v35, %v116_v36  ;;  %v293_v8 = vld [vmem:[%s415_s5] ss:$0 sm:$0xff] }
   0x7   :  { %v37_v13 = vrot.slane %v36_v11, 2  ;;  %313 = vmatmul.mubr.msk.bf16.vlgmr.msra.gmra.mrb[0].mxu1 %vm26_vm0, %v41_v9 }
   0x8   :  { %v30_v12 = vrot.slane %v29_v10, 2 }
   0x9   :  { %v38_v15 = vmax.f32 %v36_v11, %v37_v13 }
   0xa   :  { %v31_v14 = vmax.f32 %v29_v10, %v30_v12 }
   0xb   :  { %v39_v17 = vrot.slane %v38_v15, 1 }
   0xc   :  { %v32_v16 = vrot.slane %v31_v14, 1 }
   0xd   :  { %v40_v19 = vmax.f32 %v38_v15, %v39_v17 }
   0xe   :  { %v33_v18 = vmax.f32 %v31_v14, %v32_v16 }
   0xf   :  { %v45_v21 = vpack.c.bf16 %v40_v19, %v40_v19 }
  0x10   :  { %v44_v20 = vpack.c.bf16 %v33_v18, %v33_v18 }
  0x11   :  { %v58_v23 = vunpack.c.l.b16 %v45_v21 }
  0x12   :  { %v57_v22 = vunpack.c.l.b16 %v44_v20 }
  0x14   :  { %v60_v24 = vsel %vm59_vm2, %v58_v23, %v57_v22 }
  0x15   :  { %v61_v25 = vpack.c.b16 %v60_v24, %v60_v24 }
  0x17   :  { %307 = vmatmul.mubr.msk.bf16.vlgmr.msra.gmra.mrb[0].mxu0 %vm26_vm0, %v61_v25 }
  0x18   :  { %320 = vmatprep.mubr.msk.bf16.mxu0 %vm336_vm1, %v335_v0  ;;  %317 = vmatpush3.bf16.msra.mxu0 %v329_v26 }
  0x19   :  { %318 = vmatprep.subr.bf16.mxu0 %v335_v0 }
  0x1c   :  { %319 = vmatpush3.bf16.msra.mxu0 %v330_v27 }
  0xda   :  { %v187_v28 = vpop.f32.mrb[0].mxu1 }
  0xdb   :  { %v314_v29 = vpop.f32.mrb[1].mxu1 }
  0xdc   :  { %v190_v30 = vpop.f32.mrb[2].mxu1 }
  0xdd   :  { %v315_v31 = vpop.f32.mrb[3].mxu1 }
  0xea   :  { %v105_v39 = vpop.f32.mrb[0].mxu0 }
  0xeb   :  { %v106_v40 = vadd.f32 %v288_v37, %v105_v39  ;;  %v308_v41 = vpop.f32.mrb[1].mxu0 }
  0xec   :  { %v108_v42 = vpop.f32.mrb[2].mxu0 }
  0xed   :  { %v118_v43 = vrot.slane %v106_v40, %v117_v38  ;;  %v309_v44 = vpop.f32.mrb[3].mxu0 }
  0xef   :  { %v119_v46 = vcombine.high %v118_v43, %v118_v43  ;;  %v126_v47 = vrot.slane %v118_v43, %v117_v38 }
  0xf1   :  { %v137_v48 = vrot.slane %v126_v47, %v136_v45  ;;  %v133_v49 = vrot.slane %v119_v46, %v117_v38 }
  0xf3   :  { %v188_v50 = vadd.f32 %v187_v28, %v137_v48  ;;  %v141_v51 = vrot.slane %v133_v49, %v136_v45 }
  0xf5   :  { %v194_v52 = vmul.f32 %v188_v50, %v188_v50  ;;  %v191_v53 = vadd.f32 %v190_v30, %v141_v51 }
  0xf7   :  { %v196_v54 = vmul.f32 %v194_v52, %v188_v50  ;;  %v195_v55 = vmul.f32 %v191_v53, %v191_v53 }
  0xf9   :  { %v198_v56 = vmul.f32 0.044715, %v196_v54  ;;  %v197_v57 = vmul.f32 %v195_v55, %v191_v53 }
  0xfb   :  { %v200_v58 = vadd.f32 %v198_v56, %v188_v50  ;;  %v199_v59 = vmul.f32 0.044715, %v197_v57 }
  0xfd   :  { %v202_v60 = vmul.f32 0.7978846, %v200_v58  ;;  %v201_v61 = vadd.f32 %v199_v59, %v191_v53 }
  0xff   :  { %331 = vtanh.f32 %v202_v60  ;;  %v203_v62 = vmul.f32 0.7978846, %v201_v61 }
 0x101   :  { %333 = vtanh.f32 %v203_v62 }
 0x109   :  { %v332_v63 = vpop.eup %331 }
 0x10a   :  { %v206_v0 = vadd.f32 1.0, %v332_v63 }
 0x10b   :  { %v334_v1 = vpop.eup %333 }
 0x10c   :  { %v208_v2 = vmul.f32 0.5, %v206_v0  ;;  %v207_v3 = vadd.f32 1.0, %v334_v1 }
 0x10e   :  { %v209_v4 = vmul.f32 0.5, %v207_v3  ;;  %v210_v5 = vmul.f32 %v208_v2, %v188_v50 }
 0x110   :  { %v211_v6 = vmul.f32 %v209_v4, %v191_v53 }
 0x112   :  { %v212_v7 = vpack.c.bf16 %v211_v6, %v210_v5 }
 0x114   :  { %321 = vmatmul.mubr.msk.bf16.vlgmr.msra.gmra.mrb[4].mxu0 %vm236_vm3, %v212_v7 }
 0x1e7   :  { %v274_v9 = vpop.f32.mrb[4].mxu0 }
 0x1e8   :  { %v275_v10 = vadd.f32 %v293_v8, %v274_v9  ;;  %v322_v11 = vpop.f32.mrb[5].mxu0 }
 0x1e9   :  { %v277_v12 = vpop.f32.mrb[6].mxu0 }
 0x1ea   :  { %282 = vst.msk [vmem:[%s416_s6] sm:$0xff] %vm281_vm4, %v275_v10  ;;  %v278_v13 = vadd.f32 %v293_v8, %v277_v12  ;;  %v323_v14 = vpop.f32.mrb[7].mxu0 }
 0x1ec   :  { %283 = vst.msk [vmem:[%s416_s6 + $0x8] sm:$0xff] %vm281_vm4, %v278_v13 }

// kernel: simple_rebuild_fc.1
= control target key start
LH: loop header
LB: loop body
LE: loop exit
PB: predicated region body
PF: predicated region fallthrough
CT: control target
= control target key end

     0   :  { %vm26_vm0 = vcmask 130048   ;;  %v335_v0 = vmov 0.0   ;;  %vm336_vm1 = vmmov 0   ;;  %vm59_vm2 = vcmask 1041409   ;;  %s410_s2 = inlined_call_operand.vmem [shape: bf16[16,32], index: 2, kind: input, shape index: {}]   ;;  %s411_s0 = inlined_call_operand.vmem [shape: f32[2,8,16], index: 0, kind: input, shape index: {}]   ;;  %s412_s1 = inlined_call_operand.vmem [shape: bf16[16,32], index: 1, kind: input, shape index: {}]   ;;  %s413_s4 = inlined_call_operand.vmem [shape: bf16[32,12], index: 4, kind: input, shape index: {}]   ;;  %s414_s3 = inlined_call_operand.vmem [shape: f32[1,32], index: 3, kind: input, shape index: {}]   ;;  %s415_s5 = inlined_call_operand.vmem [shape: f32[1,12], index: 5, kind: input, shape index: {}]   ;;  %s416_s6 = inlined_call_operand.vmem [shape: f32[16,12], index: 6, kind: output, shape index: {}]  }
   0x1   :  { %304 = vmatprep.subr.bf16.mxu0 %v335_v0  ;;  %v327_v1 = vld [vmem:[%s410_s2] sm:$0xff]   ;;  %306 = vmatprep.mubr.msk.bf16.mxu0 %vm336_vm1, %v335_v0  ;;  %v25_v3 = vld [vmem:[%s411_s0 + $0x8] sm:$0xff]  ;;  %v337_v32 = vmov 1966171168   ;;  %v115_v34 = vlaneseq  ;;  %vm236_vm3 = vcmask 261120   ;;  %vm281_vm4 = vcmask 97280  }
   0x2   :  { %v24_v2 = vld [vmem:[%s411_s0] sm:$0xff]  ;;  %310 = vmatprep.subr.bf16.mxu1 %v335_v0  ;;  %312 = vmatprep.mubr.msk.bf16.mxu1 %vm336_vm1, %v335_v0  ;;  %v34_v5 = vsel %vm26_vm0, %v25_v3, -inf  ;;  %v330_v27 = vld [vmem:[%s413_s4 + $0x8] sm:$0xff]   ;;  %v113_v33 = vunpack.c.l.s4 %v337_v32 }
   0x3   :  { %305 = vmatpush3.bf16.msra.mxu0 %v327_v1  ;;  %v27_v4 = vsel %vm26_vm0, %v24_v2, -inf  ;;  %v328_v6 = vld [vmem:[%s412_s1] sm:$0xff]   ;;  %v35_v8 = vrot.slane %v34_v5, 4  ;;  %v41_v9 = vpack.c.bf16 %v25_v3, %v24_v2  ;;  %v116_v36 = vshrl.u32 %v115_v34, 7 }
   0x4   :  { %v28_v7 = vrot.slane %v27_v4, 4  ;;  %316 = vmatprep.subr.bf16.mxu0 %v335_v0  ;;  %311 = vmatpush3.bf16.msra.mxu1 %v328_v6  ;;  %v329_v26 = vld [vmem:[%s413_s4] sm:$0xff]   ;;  %v114_v35 = vunpack.c.0.s8 %v113_v33 }
   0x5   :  { %v36_v11 = vmax.f32 %v34_v5, %v35_v8  ;;  %v288_v37 = vld [vmem:[%s414_s3] ss:$0 sm:$0xff]  ;;  %v136_v45 = vsub.s32 0, %v116_v36 }
   0x6   :  { %v29_v10 = vmax.f32 %v27_v4, %v28_v7  ;;  %v117_v38 = vsub.s32 %v114_v35, %v116_v36  ;;  %v293_v8 = vld [vmem:[%s415_s5] ss:$0 sm:$0xff] }
   0x7   :  { %v37_v13 = vrot.slane %v36_v11, 2  ;;  %313 = vmatmul.mubr.msk.bf16.vlgmr.msra.gmra.mrb[0].mxu1 %vm26_vm0, %v41_v9 }
   0x8   :  { %v30_v12 = vrot.slane %v29_v10, 2 }
   0x9   :  { %v38_v15 = vmax.f32 %v36_v11, %v37_v13 }
   0xa   :  { %v31_v14 = vmax.f32 %v29_v10, %v30_v12 }
   0xb   :  { %v39_v17 = vrot.slane %v38_v15, 1 }
   0xc   :  { %v32_v16 = vrot.slane %v31_v14, 1 }
   0xd   :  { %v40_v19 = vmax.f32 %v38_v15, %v39_v17 }
   0xe   :  { %v33_v18 = vmax.f32 %v31_v14, %v32_v16 }
   0xf   :  { %v45_v21 = vpack.c.bf16 %v40_v19, %v40_v19 }
  0x10   :  { %v44_v20 = vpack.c.bf16 %v33_v18, %v33_v18 }
  0x11   :  { %v58_v23 = vunpack.c.l.b16 %v45_v21 }
  0x12   :  { %v57_v22 = vunpack.c.l.b16 %v44_v20 }
  0x14   :  { %v60_v24 = vsel %vm59_vm2, %v58_v23, %v57_v22 }
  0x15   :  { %v61_v25 = vpack.c.b16 %v60_v24, %v60_v24 }
  0x17   :  { %307 = vmatmul.mubr.msk.bf16.vlgmr.msra.gmra.mrb[0].mxu0 %vm26_vm0, %v61_v25 }
  0x18   :  { %320 = vmatprep.mubr.msk.bf16.mxu0 %vm336_vm1, %v335_v0  ;;  %317 = vmatpush3.bf16.msra.mxu0 %v329_v26 }
  0x19   :  { %318 = vmatprep.subr.bf16.mxu0 %v335_v0 }
  0x1c   :  { %319 = vmatpush3.bf16.msra.mxu0 %v330_v27 }
  0xda   :  { %v187_v28 = vpop.f32.mrb[0].mxu1 }
  0xdb   :  { %v314_v29 = vpop.f32.mrb[1].mxu1 }
  0xdc   :  { %v190_v30 = vpop.f32.mrb[2].mxu1 }
  0xdd   :  { %v315_v31 = vpop.f32.mrb[3].mxu1 }
  0xea   :  { %v105_v39 = vpop.f32.mrb[0].mxu0 }
  0xeb   :  { %v106_v40 = vadd.f32 %v288_v37, %v105_v39  ;;  %v308_v41 = vpop.f32.mrb[1].mxu0 }
  0xec   :  { %v108_v42 = vpop.f32.mrb[2].mxu0 }
  0xed   :  { %v118_v43 = vrot.slane %v106_v40, %v117_v38  ;;  %v309_v44 = vpop.f32.mrb[3].mxu0 }
  0xef   :  { %v119_v46 = vcombine.high %v118_v43, %v118_v43  ;;  %v126_v47 = vrot.slane %v118_v43, %v117_v38 }
  0xf1   :  { %v137_v48 = vrot.slane %v126_v47, %v136_v45  ;;  %v133_v49 = vrot.slane %v119_v46, %v117_v38 }
  0xf3   :  { %v188_v50 = vadd.f32 %v187_v28, %v137_v48  ;;  %v141_v51 = vrot.slane %v133_v49, %v136_v45 }
  0xf5   :  { %v194_v52 = vmul.f32 %v188_v50, %v188_v50  ;;  %v191_v53 = vadd.f32 %v190_v30, %v141_v51 }
  0xf7   :  { %v196_v54 = vmul.f32 %v194_v52, %v188_v50  ;;  %v195_v55 = vmul.f32 %v191_v53, %v191_v53 }
  0xf9   :  { %v198_v56 = vmul.f32 0.044715, %v196_v54  ;;  %v197_v57 = vmul.f32 %v195_v55, %v191_v53 }
  0xfb   :  { %v200_v58 = vadd.f32 %v198_v56, %v188_v50  ;;  %v199_v59 = vmul.f32 0.044715, %v197_v57 }
  0xfd   :  { %v202_v60 = vmul.f32 0.7978846, %v200_v58  ;;  %v201_v61 = vadd.f32 %v199_v59, %v191_v53 }
  0xff   :  { %331 = vtanh.f32 %v202_v60  ;;  %v203_v62 = vmul.f32 0.7978846, %v201_v61 }
 0x101   :  { %333 = vtanh.f32 %v203_v62 }
 0x109   :  { %v332_v63 = vpop.eup %331 }
 0x10a   :  { %v206_v0 = vadd.f32 1.0, %v332_v63 }
 0x10b   :  { %v334_v1 = vpop.eup %333 }
 0x10c   :  { %v208_v2 = vmul.f32 0.5, %v206_v0  ;;  %v207_v3 = vadd.f32 1.0, %v334_v1 }
 0x10e   :  { %v209_v4 = vmul.f32 0.5, %v207_v3  ;;  %v210_v5 = vmul.f32 %v208_v2, %v188_v50 }
 0x110   :  { %v211_v6 = vmul.f32 %v209_v4, %v191_v53 }
 0x112   :  { %v212_v7 = vpack.c.bf16 %v211_v6, %v210_v5 }
 0x114   :  { %321 = vmatmul.mubr.msk.bf16.vlgmr.msra.gmra.mrb[4].mxu0 %vm236_vm3, %v212_v7 }
 0x1e7   :  { %v274_v9 = vpop.f32.mrb[4].mxu0 }
 0x1e8   :  { %v275_v10 = vadd.f32 %v293_v8, %v274_v9  ;;  %v322_v11 = vpop.f32.mrb[5].mxu0 }
 0x1e9   :  { %v277_v12 = vpop.f32.mrb[6].mxu0 }
 0x1ea   :  { %282 = vst.msk [vmem:[%s416_s6] sm:$0xff] %vm281_vm4, %v275_v10  ;;  %v278_v13 = vadd.f32 %v293_v8, %v277_v12  ;;  %v323_v14 = vpop.f32.mrb[7].mxu0 }
 0x1ec   :  { %283 = vst.msk [vmem:[%s416_s6 + $0x8] sm:$0xff] %vm281_vm4, %v278_v13 }

</bundles_post_ra>
